<compile_context>
chip_gen: v7x
topology: tpu7x:2x2x1
jax: 0.10.0
libtpu: 0.0.40
codegen_flags: <defaults>
</compile_context>

<pallas_src>
import jax
import jax.numpy as jnp
from jax.experimental import pallas as pl
from jax.experimental.pallas import tpu as pltpu

LANE = 128
VMEM_LIMIT = 48 * 1024 * 1024  # safe on v5e/v6e (128 MiB) and v7x (64 MiB)
NEG_BIG = -1e30                # masks padded class lanes before softmax


def _round_up(v, m):
    return ((v + m - 1) // m) * m


def _pad_to(x, shape, value=0.0):
    return jnp.pad(
        x, [(0, t - s) for s, t in zip(x.shape, shape)], constant_values=value
    )


# --------------------------------------------------------------------------
# Kernels
# --------------------------------------------------------------------------
def proj_kernel(x_ref, w_ref, out_ref):
    # P1 = X @ W1, projection hoisted out of the aggregation loops.
    out_ref[...] = jnp.dot(
        x_ref[...], w_ref[...], preferred_element_type=jnp.float32
    ).astype(out_ref.dtype)


def agg1_kernel(a_ref, p1_ref, b1_ref, w2_ref, out_ref, acc_ref):
    # out = relu(A_hat @ P1 + b1) @ W2, accumulated over the K (A-column) axis.
    @pl.when(pl.program_id(1) == 0)
    def _():
        acc_ref[...] = jnp.zeros_like(acc_ref)

    acc_ref[...] += jnp.dot(
        a_ref[...], p1_ref[...], preferred_element_type=jnp.float32
    )

    @pl.when(pl.program_id(1) == pl.num_programs(1) - 1)
    def _():
        h = jnp.maximum(acc_ref[...] + b1_ref[...], 0.0)  # bias + ReLU in f32
        out_ref[...] = jnp.dot(
            h.astype(jnp.bfloat16), w2_ref[...], preferred_element_type=jnp.float32
        ).astype(out_ref.dtype)


def agg2_kernel(a_ref, p2_ref, b2_ref, out_ref):
    # out = log_softmax(A_hat @ P2 + b2); padded class lanes carry b2 = -1e30,
    # so no in-kernel masking is needed (they never win the max, exp -> 0).
    @pl.when(pl.program_id(1) == 0)
    def _():
        out_ref[...] = jnp.zeros_like(out_ref)

    out_ref[...] += jnp.dot(
        a_ref[...], p2_ref[...], preferred_element_type=jnp.float32
    )

    @pl.when(pl.program_id(1) == pl.num_programs(1) - 1)
    def _():
        z = out_ref[...] + b2_ref[...]
        m = jnp.max(z, axis=1, keepdims=True)
        e = jnp.exp(z - m)
        lse = jnp.log(jnp.sum(e, axis=1, keepdims=True))
        out_ref[...] = z - m - lse


# --------------------------------------------------------------------------
# Graph glue (plain JAX)
# --------------------------------------------------------------------------
def build_norm_adj(edge_index, num_nodes, padded_nodes):
    """A_hat = D^{-1/2}(A + remaining self loops)D^{-1/2}, zero-padded."""
    src, dst = edge_index[0], edge_index[1]
    a = jnp.zeros((padded_nodes, padded_nodes), jnp.float32).at[dst, src].add(1.0)
    # add_remaining_self_loops: only add a loop where one does not already exist
    diag = jnp.diagonal(a)
    node_ids = jnp.arange(padded_nodes)
    a = a + jnp.diag(jnp.where((diag == 0.0) & (node_ids < num_nodes), 1.0, 0.0))
    deg = jnp.sum(a, axis=1)
    dinv = jnp.where(deg > 0, jax.lax.rsqrt(deg), 0.0)
    return a * dinv[:, None] * dinv[None, :]


# --------------------------------------------------------------------------
# Forward pass
# --------------------------------------------------------------------------
def gcn_forward(x, edge_index, w1, b1, w2, b2):
    n, f_in = x.shape
    hidden = w1.shape[1]
    n_cls = w2.shape[1]

    NP = _round_up(n, LANE)
    FP = _round_up(f_in, LANE)
    HP = _round_up(hidden, LANE)
    CP = _round_up(n_cls, LANE)

    # Row tile / K tile: biggest that divide NP, well under v7x 64 MiB VMEM.
    TM = next(t for t in (512, 256, 128) if NP % t == 0)
    TK = next(t for t in (2048, 1024, 512, 256, 128) if NP % t == 0)

    a_hat = build_norm_adj(edge_index, n, NP).astype(jnp.bfloat16)
    xp = _pad_to(x, (NP, FP)).astype(jnp.bfloat16)
    w1p = _pad_to(w1, (FP, HP)).astype(jnp.bfloat16)
    b1p = _pad_to(b1.reshape(1, -1), (1, HP)).astype(jnp.float32)
    w2p = _pad_to(w2, (HP, CP)).astype(jnp.bfloat16)
    # Padded class lanes get a huge negative bias -> masked out of the softmax.
    b2p = _pad_to(b2.reshape(1, -1), (1, CP), value=NEG_BIG).astype(jnp.float32)

    # ---- pass 1: P1 = X @ W1 -------------------------------------------
    p1 = pl.pallas_call(
        proj_kernel,
        out_shape=jax.ShapeDtypeStruct((NP, HP), jnp.bfloat16),
        grid_spec=pltpu.PrefetchScalarGridSpec(
            num_scalar_prefetch=0,
            grid=(NP // TM,),
            in_specs=[
                pl.BlockSpec((TM, FP), lambda i: (i, 0)),
                pl.BlockSpec((FP, HP), lambda i: (0, 0)),
            ],
            out_specs=pl.BlockSpec((TM, HP), lambda i: (i, 0)),
        ),
        compiler_params=pltpu.CompilerParams(
            dimension_semantics=("parallel",), vmem_limit_bytes=VMEM_LIMIT
        ),
        cost_estimate=pl.CostEstimate(
            flops=2 * NP * FP * HP,
            transcendentals=0,
            bytes_accessed=2 * (NP * FP + FP * HP + NP * HP),
        ),
    )(xp, w1p)

    # ---- pass 2: P2 = relu(A_hat @ P1 + b1) @ W2 ------------------------
    # TODO(synk): for very large graphs, sweep pipeline_mode=pl.Buffered(3) on
    # the A_hat spec and/or switch to a sparse gather formulation.
    p2 = pl.pallas_call(
        agg1_kernel,
        out_shape=jax.ShapeDtypeStruct((NP, CP), jnp.bfloat16),
        grid_spec=pltpu.PrefetchScalarGridSpec(
            num_scalar_prefetch=0,
            grid=(NP // TM, NP // TK),
            in_specs=[
                pl.BlockSpec((TM, TK), lambda i, k: (i, k)),
                pl.BlockSpec((TK, HP), lambda i, k: (k, 0)),
                pl.BlockSpec((1, HP), lambda i, k: (0, 0)),
                pl.BlockSpec((HP, CP), lambda i, k: (0, 0)),
            ],
            out_specs=pl.BlockSpec((TM, CP), lambda i, k: (i, 0)),
            scratch_shapes=[pltpu.VMEM((TM, HP), jnp.float32)],
        ),
        compiler_params=pltpu.CompilerParams(
            dimension_semantics=("parallel", "arbitrary"),
            vmem_limit_bytes=VMEM_LIMIT,
        ),
        cost_estimate=pl.CostEstimate(
            flops=2 * NP * NP * HP + 2 * NP * HP * CP,
            transcendentals=0,
            bytes_accessed=2 * (NP * NP + NP * HP + HP * CP + NP * CP),
        ),
    )(a_hat, p1, b1p, w2p)

    # ---- pass 3: out = log_softmax(A_hat @ P2 + b2) ----------------------
    out_full = pl.pallas_call(
        agg2_kernel,
        out_shape=jax.ShapeDtypeStruct((NP, CP), jnp.float32),
        grid_spec=pltpu.PrefetchScalarGridSpec(
            num_scalar_prefetch=0,
            grid=(NP // TM, NP // TK),
            in_specs=[
                pl.BlockSpec((TM, TK), lambda i, k: (i, k)),
                pl.BlockSpec((TK, CP), lambda i, k: (k, 0)),
                pl.BlockSpec((1, CP), lambda i, k: (0, 0)),
            ],
            out_specs=pl.BlockSpec((TM, CP), lambda i, k: (i, 0)),
        ),
        compiler_params=pltpu.CompilerParams(
            dimension_semantics=("parallel", "arbitrary"),
            vmem_limit_bytes=VMEM_LIMIT,
        ),
        cost_estimate=pl.CostEstimate(
            flops=2 * NP * NP * CP,
            transcendentals=NP * CP,
            bytes_accessed=2 * (NP * NP + NP * CP) + 4 * NP * CP,
        ),
    )(a_hat, p2, b2p)

    return out_full[:n, :n_cls]


gcn_forward_jit = jax.jit(gcn_forward)


# --------------------------------------------------------------------------
# Pure-JAX f32 reference (same GCNConv semantics)
# --------------------------------------------------------------------------
def gcn_reference(x, edge_index, w1, b1, w2, b2):
    n = x.shape[0]
    a = build_norm_adj(edge_index, n, n)
    h = jnp.maximum(a @ (x @ w1) + b1, 0.0)
    z = a @ (h @ w2) + b2
    return jax.nn.log_softmax(z, axis=1)


if __name__ == "__main__":
    key = jax.random.PRNGKey(0)
    N, E = 16, 40
    input_dim, hidden_dim, output_dim = 8, 32, 4

    k = jax.random.split(key, 4)
    x = jax.random.normal(k[0], (N, input_dim), dtype=jnp.float32)
    edge_index = jax.random.randint(k[1], (2, E), 0, N, dtype=jnp.int32)

    def glorot(kk, shape):
        lim = (6.0 / (shape[0] + shape[1])) ** 0.5
        return jax.random.uniform(kk, shape, jnp.float32, -lim, lim)

    w1 = glorot(k[2], (input_dim, hidden_dim))
    b1 = jnp.zeros((hidden_dim,), jnp.float32)
    w2 = glorot(k[3], (hidden_dim, output_dim))
    b2 = jnp.zeros((output_dim,), jnp.float32)

    out = gcn_forward_jit(x, edge_index, w1, b1, w2, b2)
    jax.block_until_ready(out)

    assert out.shape == (N, output_dim)
    # rows of log_softmax should exp-sum to 1
    assert jnp.allclose(jnp.sum(jnp.exp(out), axis=1), 1.0, atol=1e-4)
    # bf16 matmuls vs f32 reference: loose tolerance
    ref = gcn_reference(x, edge_index, w1, b1, w2, b2)
    assert jnp.max(jnp.abs(out - ref)) < 7.5e-2, jnp.max(jnp.abs(out - ref))
    print("KERNEL_OK")
</pallas_src>

<mosaic_0001>
module attributes {stable_mosaic.version = 11 : i64} {
  func.func @proj_kernel(%arg0: i32, %arg1: memref<128x128xbf16, #tpu.memory_space<vmem>>, %arg2: memref<128x128xbf16, #tpu.memory_space<vmem>>, %arg3: memref<128x128xbf16, #tpu.memory_space<vmem>>) attributes {dimension_semantics = [#tpu.dimension_semantics<parallel>], iteration_bounds = array<i64: 1>, scalar_prefetch = 0 : i64, scratch_operands = 0 : i64, tpu.core_type = #tpu.core_type<tc>, window_params = [{transform_indices = @transform_0, window_bounds = array<i64: 128, 128>}, {pipeline_mode = #tpu.pipeline_mode<synchronous>, transform_indices = @transform_1, window_bounds = array<i64: 128, 128>}, {transform_indices = @transform_2, window_bounds = array<i64: 128, 128>}]} {
    %c0 = arith.constant 0 : index
    %c0_0 = arith.constant 0 : index
    %0 = vector.load %arg1[%c0, %c0_0] : memref<128x128xbf16, #tpu.memory_space<vmem>>, vector<128x128xbf16>
    %c0_1 = arith.constant 0 : index
    %c0_2 = arith.constant 0 : index
    %1 = vector.load %arg2[%c0_1, %c0_2] : memref<128x128xbf16, #tpu.memory_space<vmem>>, vector<128x128xbf16>
    %cst = arith.constant dense<0.000000e+00> : vector<128x128xf32>
    %2 = tpu.matmul %0, %1, %cst {dimension_numbers = #tpu.dot_dimension_numbers<[1], [0], [0], [1], [0, 0, 1, 1], [], []>} : vector<128x128xbf16>, vector<128x128xbf16>, vector<128x128xf32> -> vector<128x128xf32>
    %3 = arith.truncf %2 : vector<128x128xf32> to vector<128x128xbf16>
    %c0_3 = arith.constant 0 : index
    %c0_4 = arith.constant 0 : index
    %4 = vector.load %arg3[%c0_3, %c0_4] : memref<128x128xbf16, #tpu.memory_space<vmem>>, vector<128x128xbf16>
    tpu.vector_store %arg3[%c0_3, %c0_4], %3 {strides = array<i32>} : memref<128x128xbf16, #tpu.memory_space<vmem>>, vector<128x128xbf16>,
    return
  }
  func.func @transform_0(%arg0: i32) -> (i32, i32) {
    %c0_i32 = arith.constant 0 : i32
    %c0_i32_0 = arith.constant 0 : i32
    return %arg0, %c0_i32 : i32, i32
  }
  func.func @transform_1(%arg0: i32) -> (i32, i32) {
    %c0_i32 = arith.constant 0 : i32
    %c0_i32_0 = arith.constant 0 : i32
    %c0_i32_1 = arith.constant 0 : i32
    return %c0_i32, %c0_i32_0 : i32, i32
  }
  func.func @transform_2(%arg0: i32) -> (i32, i32) {
    %c0_i32 = arith.constant 0 : i32
    %c0_i32_0 = arith.constant 0 : i32
    return %arg0, %c0_i32 : i32, i32
  }
}

module attributes {stable_mosaic.version = 11 : i64} {
  func.func @agg1_kernel(%arg0: i32, %arg1: i32, %arg2: memref<128x128xbf16, #tpu.memory_space<vmem>>, %arg3: memref<128x128xbf16, #tpu.memory_space<vmem>>, %arg4: memref<1x128xf32, #tpu.memory_space<vmem>>, %arg5: memref<128x128xbf16, #tpu.memory_space<vmem>>, %arg6: memref<128x128xbf16, #tpu.memory_space<vmem>>, %arg7: memref<128x128xf32, #tpu.memory_space<vmem>>) attributes {dimension_semantics = [#tpu.dimension_semantics<parallel>, #tpu.dimension_semantics<arbitrary>], iteration_bounds = array<i64: 1, 1>, scalar_prefetch = 0 : i64, scratch_operands = 1 : i64, tpu.core_type = #tpu.core_type<tc>, window_params = [{transform_indices = @transform_0, window_bounds = array<i64: 128, 128>}, {transform_indices = @transform_1, window_bounds = array<i64: 128, 128>}, {pipeline_mode = #tpu.pipeline_mode<synchronous>, transform_indices = @transform_2, window_bounds = array<i64: 1, 128>}, {pipeline_mode = #tpu.pipeline_mode<synchronous>, transform_indices = @transform_3, window_bounds = array<i64: 128, 128>}, {transform_indices = @transform_4, window_bounds = array<i64: 128, 128>}]} {
    %c0_i32 = arith.constant 0 : i32
    %0 = arith.cmpi eq, %arg1, %c0_i32 : i32
    %1 = arith.extui %0 : i1 to i32
    %c0_i32_0 = arith.constant 0 : i32
    %2 = arith.cmpi ne, %1, %c0_i32_0 : i32
    scf.if %2 {
      %cst_10 = arith.constant 0.000000e+00 : f32
      %12 = vector.broadcast %cst_10 : f32 to vector<128x128xf32>
      %c0_11 = arith.constant 0 : index
      %c0_12 = arith.constant 0 : index
      %13 = vector.load %arg7[%c0_11, %c0_12] : memref<128x128xf32, #tpu.memory_space<vmem>>, vector<128x128xf32>
      tpu.vector_store %arg7[%c0_11, %c0_12], %12 {strides = array<i32>} : memref<128x128xf32, #tpu.memory_space<vmem>>, vector<128x128xf32>,
    } else {
    }
    %c0 = arith.constant 0 : index
    %c0_1 = arith.constant 0 : index
    %3 = vector.load %arg7[%c0, %c0_1] : memref<128x128xf32, #tpu.memory_space<vmem>>, vector<128x128xf32>
    %c0_2 = arith.constant 0 : index
    %c0_3 = arith.constant 0 : index
    %4 = vector.load %arg2[%c0_2, %c0_3] : memref<128x128xbf16, #tpu.memory_space<vmem>>, vector<128x128xbf16>
    %c0_4 = arith.constant 0 : index
    %c0_5 = arith.constant 0 : index
    %5 = vector.load %arg3[%c0_4, %c0_5] : memref<128x128xbf16, #tpu.memory_space<vmem>>, vector<128x128xbf16>
    %cst = arith.constant dense<0.000000e+00> : vector<128x128xf32>
    %6 = tpu.matmul %4, %5, %cst {dimension_numbers = #tpu.dot_dimension_numbers<[1], [0], [0], [1], [0, 0, 1, 1], [], []>} : vector<128x128xbf16>, vector<128x128xbf16>, vector<128x128xf32> -> vector<128x128xf32>
    %7 = arith.addf %3, %6 : vector<128x128xf32>
    %c0_6 = arith.constant 0 : index
    %c0_7 = arith.constant 0 : index
    %8 = vector.load %arg7[%c0_6, %c0_7] : memref<128x128xf32, #tpu.memory_space<vmem>>, vector<128x128xf32>
    tpu.vector_store %arg7[%c0_6, %c0_7], %7 {strides = array<i32>} : memref<128x128xf32, #tpu.memory_space<vmem>>, vector<128x128xf32>,
    %c0_i32_8 = arith.constant 0 : i32
    %9 = arith.cmpi eq, %arg1, %c0_i32_8 : i32
    %10 = arith.extui %9 : i1 to i32
    %c0_i32_9 = arith.constant 0 : i32
    %11 = arith.cmpi ne, %10, %c0_i32_9 : i32
    scf.if %11 {
      %c0_10 = arith.constant 0 : index
      %c0_11 = arith.constant 0 : index
      %12 = vector.load %arg7[%c0_10, %c0_11] : memref<128x128xf32, #tpu.memory_space<vmem>>, vector<128x128xf32>
      %c0_12 = arith.constant 0 : index
      %c0_13 = arith.constant 0 : index
      %13 = vector.load %arg4[%c0_12, %c0_13] : memref<1x128xf32, #tpu.memory_space<vmem>>, vector<1x128xf32>
      %14 = vector.broadcast %13 : vector<1x128xf32> to vector<128x128xf32>
      %15 = arith.addf %12, %14 : vector<128x128xf32>
      %cst_14 = arith.constant 0.000000e+00 : f32
      %16 = vector.broadcast %cst_14 : f32 to vector<128x128xf32>
      %17 = arith.maximumf %15, %16 : vector<128x128xf32>
      %18 = arith.truncf %17 : vector<128x128xf32> to vector<128x128xbf16>
      %c0_15 = arith.constant 0 : index
      %c0_16 = arith.constant 0 : index
      %19 = vector.load %arg5[%c0_15, %c0_16] : memref<128x128xbf16, #tpu.memory_space<vmem>>, vector<128x128xbf16>
      %cst_17 = arith.constant dense<0.000000e+00> : vector<128x128xf32>
      %20 = tpu.matmul %18, %19, %cst_17 {dimension_numbers = #tpu.dot_dimension_numbers<[1], [0], [0], [1], [0, 0, 1, 1], [], []>} : vector<128x128xbf16>, vector<128x128xbf16>, vector<128x128xf32> -> vector<128x128xf32>
      %21 = arith.truncf %20 : vector<128x128xf32> to vector<128x128xbf16>
      %c0_18 = arith.constant 0 : index
      %c0_19 = arith.constant 0 : index
      %22 = vector.load %arg6[%c0_18, %c0_19] : memref<128x128xbf16, #tpu.memory_space<vmem>>, vector<128x128xbf16>
      tpu.vector_store %arg6[%c0_18, %c0_19], %21 {strides = array<i32>} : memref<128x128xbf16, #tpu.memory_space<vmem>>, vector<128x128xbf16>,
    } else {
    }
    return
  }
  func.func @transform_0(%arg0: i32, %arg1: i32) -> (i32, i32) {
    %c0_i32 = arith.constant 0 : i32
    return %arg0, %arg1 : i32, i32
  }
  func.func @transform_1(%arg0: i32, %arg1: i32) -> (i32, i32) {
    %c0_i32 = arith.constant 0 : i32
    %c0_i32_0 = arith.constant 0 : i32
    return %arg1, %c0_i32 : i32, i32
  }
  func.func @transform_2(%arg0: i32, %arg1: i32) -> (i32, i32) {
    %c0_i32 = arith.constant 0 : i32
    %c0_i32_0 = arith.constant 0 : i32
    %c0_i32_1 = arith.constant 0 : i32
    return %c0_i32, %c0_i32_0 : i32, i32
  }
  func.func @transform_3(%arg0: i32, %arg1: i32) -> (i32, i32) {
    %c0_i32 = arith.constant 0 : i32
    %c0_i32_0 = arith.constant 0 : i32
    %c0_i32_1 = arith.constant 0 : i32
    return %c0_i32, %c0_i32_0 : i32, i32
  }
  func.func @transform_4(%arg0: i32, %arg1: i32) -> (i32, i32) {
    %c0_i32 = arith.constant 0 : i32
    %c0_i32_0 = arith.constant 0 : i32
    return %arg0, %c0_i32 : i32, i32
  }
}

module attributes {stable_mosaic.version = 11 : i64} {
  func.func @agg2_kernel(%arg0: i32, %arg1: i32, %arg2: memref<128x128xbf16, #tpu.memory_space<vmem>>, %arg3: memref<128x128xbf16, #tpu.memory_space<vmem>>, %arg4: memref<1x128xf32, #tpu.memory_space<vmem>>, %arg5: memref<128x128xf32, #tpu.memory_space<vmem>>) attributes {dimension_semantics = [#tpu.dimension_semantics<parallel>, #tpu.dimension_semantics<arbitrary>], iteration_bounds = array<i64: 1, 1>, scalar_prefetch = 0 : i64, scratch_operands = 0 : i64, tpu.core_type = #tpu.core_type<tc>, window_params = [{transform_indices = @transform_0, window_bounds = array<i64: 128, 128>}, {transform_indices = @transform_1, window_bounds = array<i64: 128, 128>}, {pipeline_mode = #tpu.pipeline_mode<synchronous>, transform_indices = @transform_2, window_bounds = array<i64: 1, 128>}, {transform_indices = @transform_3, window_bounds = array<i64: 128, 128>}]} {
    %c0_i32 = arith.constant 0 : i32
    %0 = arith.cmpi eq, %arg1, %c0_i32 : i32
    %1 = arith.extui %0 : i1 to i32
    %c0_i32_0 = arith.constant 0 : i32
    %2 = arith.cmpi ne, %1, %c0_i32_0 : i32
    scf.if %2 {
      %cst_10 = arith.constant 0.000000e+00 : f32
      %12 = vector.broadcast %cst_10 : f32 to vector<128x128xf32>
      %c0_11 = arith.constant 0 : index
      %c0_12 = arith.constant 0 : index
      %13 = vector.load %arg5[%c0_11, %c0_12] : memref<128x128xf32, #tpu.memory_space<vmem>>, vector<128x128xf32>
      tpu.vector_store %arg5[%c0_11, %c0_12], %12 {strides = array<i32>} : memref<128x128xf32, #tpu.memory_space<vmem>>, vector<128x128xf32>,
    } else {
    }
    %c0 = arith.constant 0 : index
    %c0_1 = arith.constant 0 : index
    %3 = vector.load %arg5[%c0, %c0_1] : memref<128x128xf32, #tpu.memory_space<vmem>>, vector<128x128xf32>
    %c0_2 = arith.constant 0 : index
    %c0_3 = arith.constant 0 : index
    %4 = vector.load %arg2[%c0_2, %c0_3] : memref<128x128xbf16, #tpu.memory_space<vmem>>, vector<128x128xbf16>
    %c0_4 = arith.constant 0 : index
    %c0_5 = arith.constant 0 : index
    %5 = vector.load %arg3[%c0_4, %c0_5] : memref<128x128xbf16, #tpu.memory_space<vmem>>, vector<128x128xbf16>
    %cst = arith.constant dense<0.000000e+00> : vector<128x128xf32>
    %6 = tpu.matmul %4, %5, %cst {dimension_numbers = #tpu.dot_dimension_numbers<[1], [0], [0], [1], [0, 0, 1, 1], [], []>} : vector<128x128xbf16>, vector<128x128xbf16>, vector<128x128xf32> -> vector<128x128xf32>
    %7 = arith.addf %3, %6 : vector<128x128xf32>
    %c0_6 = arith.constant 0 : index
    %c0_7 = arith.constant 0 : index
    %8 = vector.load %arg5[%c0_6, %c0_7] : memref<128x128xf32, #tpu.memory_space<vmem>>, vector<128x128xf32>
    tpu.vector_store %arg5[%c0_6, %c0_7], %7 {strides = array<i32>} : memref<128x128xf32, #tpu.memory_space<vmem>>, vector<128x128xf32>,
    %c0_i32_8 = arith.constant 0 : i32
    %9 = arith.cmpi eq, %arg1, %c0_i32_8 : i32
    %10 = arith.extui %9 : i1 to i32
    %c0_i32_9 = arith.constant 0 : i32
    %11 = arith.cmpi ne, %10, %c0_i32_9 : i32
    scf.if %11 {
      %c0_10 = arith.constant 0 : index
      %c0_11 = arith.constant 0 : index
      %12 = vector.load %arg5[%c0_10, %c0_11] : memref<128x128xf32, #tpu.memory_space<vmem>>, vector<128x128xf32>
      %c0_12 = arith.constant 0 : index
      %c0_13 = arith.constant 0 : index
      %13 = vector.load %arg4[%c0_12, %c0_13] : memref<1x128xf32, #tpu.memory_space<vmem>>, vector<1x128xf32>
      %14 = vector.broadcast %13 : vector<1x128xf32> to vector<128x128xf32>
      %15 = arith.addf %12, %14 : vector<128x128xf32>
      %cst_14 = arith.constant dense<0xFF800000> : vector<128xf32>
      %16 = vector.multi_reduction <maximumf>, %15, %cst_14 [1] : vector<128x128xf32> to vector<128xf32>
      %17 = vector.shape_cast %16 : vector<128xf32> to vector<128x1xf32>
      %18 = vector.broadcast %17 : vector<128x1xf32> to vector<128x128xf32>
      %19 = arith.subf %15, %18 : vector<128x128xf32>
      %20 = math.exp %19 : vector<128x128xf32>
      %cst_15 = arith.constant dense<0.000000e+00> : vector<128xf32>
      %21 = vector.multi_reduction <add>, %20, %cst_15 [1] : vector<128x128xf32> to vector<128xf32>
      %22 = vector.shape_cast %21 : vector<128xf32> to vector<128x1xf32>
      %23 = math.log %22 : vector<128x1xf32>
      %24 = vector.broadcast %17 : vector<128x1xf32> to vector<128x128xf32>
      %25 = arith.subf %15, %24 : vector<128x128xf32>
      %26 = vector.broadcast %23 : vector<128x1xf32> to vector<128x128xf32>
      %27 = arith.subf %25, %26 : vector<128x128xf32>
      %c0_16 = arith.constant 0 : index
      %c0_17 = arith.constant 0 : index
      %28 = vector.load %arg5[%c0_16, %c0_17] : memref<128x128xf32, #tpu.memory_space<vmem>>, vector<128x128xf32>
      tpu.vector_store %arg5[%c0_16, %c0_17], %27 {strides = array<i32>} : memref<128x128xf32, #tpu.memory_space<vmem>>, vector<128x128xf32>,
    } else {
    }
    return
  }
  func.func @transform_0(%arg0: i32, %arg1: i32) -> (i32, i32) {
    %c0_i32 = arith.constant 0 : i32
    return %arg0, %arg1 : i32, i32
  }
  func.func @transform_1(%arg0: i32, %arg1: i32) -> (i32, i32) {
    %c0_i32 = arith.constant 0 : i32
    %c0_i32_0 = arith.constant 0 : i32
    return %arg1, %c0_i32 : i32, i32
  }
  func.func @transform_2(%arg0: i32, %arg1: i32) -> (i32, i32) {
    %c0_i32 = arith.constant 0 : i32
    %c0_i32_0 = arith.constant 0 : i32
    %c0_i32_1 = arith.constant 0 : i32
    return %c0_i32, %c0_i32_0 : i32, i32
  }
  func.func @transform_3(%arg0: i32, %arg1: i32) -> (i32, i32) {
    %c0_i32 = arith.constant 0 : i32
    %c0_i32_0 = arith.constant 0 : i32
    return %arg0, %c0_i32 : i32, i32
  }
}

</mosaic_0001>

<bundles_post_ra>
// kernel: gcn_forward.3
= control target key start
LH: loop header
LB: loop body
LE: loop exit
PB: predicated region body
PF: predicated region fallthrough
CT: control target
= control target key end

     0   :  { %s583_s1 = inlined_call_operand.vmem [shape: bf16[128,128], index: 1, kind: input, shape index: {}]   ;;  %s584_s0 = inlined_call_operand.vmem [shape: bf16[128,128], index: 0, kind: input, shape index: {}]   ;;  %s585_s2 = inlined_call_operand.vmem [shape: bf16[128,128], index: 2, kind: output, shape index: {}]  }
   0x1   :  { %v480_v0 = vld [vmem:[%s583_s1] sm:$0xff]   ;;  %v481_v1 = vld [vmem:[%s583_s1 + $0x8] sm:$0xff]   ;;  %v482_v2 = vld [vmem:[%s583_s1 + $0x10] sm:$0xff]  }
   0x2   :  { %432 = vmatprep.subr.bf16.mxu0 %v480_v0  ;;  %464 = vmatprep.subr.bf16.mxu1 %v480_v0  ;;  %v483_v3 = vld [vmem:[%s583_s1 + $0x18] sm:$0xff]   ;;  %v488_v4 = vld [vmem:[%s584_s0] sm:$0xff]   ;;  %v485_v7 = vld [vmem:[%s583_s1 + $0x28] sm:$0xff]  }
   0x3   :  { %433 = vmatpush3.bf16.msra.mxu0 %v480_v0  ;;  %472 = vmatpush3.bf16.msra.mxu1 %v480_v0  ;;  %v489_v5 = vld [vmem:[%s584_s0 + $0x20] sm:$0xff]   ;;  %v486_v8 = vld [vmem:[%s583_s1 + $0x30] sm:$0xff]   ;;  %v487_v9 = vld [vmem:[%s583_s1 + $0x38] sm:$0xff]  }
   0x4   :  { %434 = vmatprep.subr.bf16.mxu0 %v481_v1  ;;  %465 = vmatprep.subr.bf16.mxu1 %v481_v1  ;;  %v484_v6 = vld [vmem:[%s583_s1 + $0x20] sm:$0xff]   ;;  %v490_v10 = vld [vmem:[%s584_s0 + $0x8] sm:$0xff]   ;;  %v492_v12 = vld [vmem:[%s584_s0 + $0x10] sm:$0xff]  }
   0x5   :  { %448 = vmatprep.mubr.bf16.mxu0 %v488_v4  ;;  %456 = vmatprep.mubr.bf16.mxu1 %v489_v5  ;;  %v491_v11 = vld [vmem:[%s584_s0 + $0x28] sm:$0xff]   ;;  %v493_v13 = vld [vmem:[%s584_s0 + $0x30] sm:$0xff]   ;;  %v494_v14 = vld [vmem:[%s584_s0 + $0x18] sm:$0xff]  }
   0x6   :  { %v495_v15 = vld [vmem:[%s584_s0 + $0x38] sm:$0xff]  }
   0x7   :  { %435 = vmatpush3.bf16.msra.mxu0 %v481_v1  ;;  %473 = vmatpush3.bf16.msra.mxu1 %v481_v1 }
   0x8   :  { %436 = vmatprep.subr.bf16.mxu0 %v482_v2  ;;  %466 = vmatprep.subr.bf16.mxu1 %v482_v2 }
   0xb   :  { %437 = vmatpush3.bf16.msra.mxu0 %v482_v2  ;;  %474 = vmatpush3.bf16.msra.mxu1 %v482_v2 }
   0xc   :  { %438 = vmatprep.subr.bf16.mxu0 %v483_v3  ;;  %467 = vmatprep.subr.bf16.mxu1 %v483_v3 }
   0xf   :  { %439 = vmatpush3.bf16.msra.mxu0 %v483_v3  ;;  %475 = vmatpush3.bf16.msra.mxu1 %v483_v3 }
  0x10   :  { %440 = vmatprep.subr.bf16.mxu0 %v484_v6  ;;  %468 = vmatprep.subr.bf16.mxu1 %v484_v6 }
  0x13   :  { %441 = vmatpush3.bf16.msra.mxu0 %v484_v6  ;;  %476 = vmatpush3.bf16.msra.mxu1 %v484_v6 }
  0x14   :  { %442 = vmatprep.subr.bf16.mxu0 %v485_v7  ;;  %469 = vmatprep.subr.bf16.mxu1 %v485_v7 }
  0x17   :  { %443 = vmatpush3.bf16.msra.mxu0 %v485_v7  ;;  %477 = vmatpush3.bf16.msra.mxu1 %v485_v7 }
  0x18   :  { %444 = vmatprep.subr.bf16.mxu0 %v486_v8  ;;  %470 = vmatprep.subr.bf16.mxu1 %v486_v8 }
  0x1b   :  { %445 = vmatpush3.bf16.msra.mxu0 %v486_v8  ;;  %478 = vmatpush3.bf16.msra.mxu1 %v486_v8 }
  0x1c   :  { %446 = vmatprep.subr.bf16.mxu0 %v487_v9  ;;  %471 = vmatprep.subr.bf16.mxu1 %v487_v9 }
  0x1f   :  { %447 = vmatpush3.bf16.msra.mxu0 %v487_v9  ;;  %479 = vmatpush3.bf16.msra.mxu1 %v487_v9 }
  0x22   :  { %449 = vmatmul.mubr.bf16.vlgmr.msra.gmra.mrb[0].mxu0 %v490_v10  ;;  %457 = vmatmul.mubr.bf16.vlgmr.msra.gmra.mrb[0].mxu1 %v491_v11 }
  0x23   :  { %452 = vmatprep.mubr.bf16.mxu0 %v492_v12  ;;  %460 = vmatprep.mubr.bf16.mxu1 %v493_v13 }
  0x2a   :  { %453 = vmatmul.mubr.bf16.gmra.mrb[4].mxu0 %v494_v14  ;;  %461 = vmatmul.mubr.bf16.gmra.mrb[4].mxu1 %v495_v15 }
  0xf5   :  { %v450_v16 = vpop.f32.mrb[0].mxu0  ;;  %v458_v17 = vpop.f32.mrb[0].mxu1 }
  0xf6   :  { %v174_v18 = vpop.f32.mrb[1].mxu0  ;;  %v206_v19 = vpop.f32.mrb[1].mxu1 }
  0xf7   :  { %v451_v20 = vpop.f32.mrb[2].mxu0  ;;  %v459_v21 = vpop.f32.mrb[2].mxu1 }
  0xf8   :  { %v377_v22 = vpack.c.bf16 %v451_v20, %v450_v16  ;;  %v397_v23 = vpack.c.bf16 %v459_v21, %v458_v17  ;;  %v177_v24 = vpop.f32.mrb[3].mxu0  ;;  %v209_v25 = vpop.f32.mrb[3].mxu1 }
  0xf9   :  { %v372_v26 = vpack.c.bf16 %v177_v24, %v174_v18  ;;  %v392_v27 = vpack.c.bf16 %v209_v25, %v206_v19 }
  0xfa   :  { %409 = vst [vmem:[%s585_s2 + $0x8] sm:$0xff] %v377_v22   ;;  %413 = vst [vmem:[%s585_s2 + $0x28] sm:$0xff] %v397_v23  }
  0xfb   :  { %373 = vst [vmem:[%s585_s2] sm:$0xff] %v372_v26   ;;  %412 = vst [vmem:[%s585_s2 + $0x20] sm:$0xff] %v392_v27  }
  0xfd   :  { %v454_v28 = vpop.f32.mrb[4].mxu0  ;;  %v462_v29 = vpop.f32.mrb[4].mxu1 }
  0xfe   :  { %v190_v30 = vpop.f32.mrb[5].mxu0  ;;  %v222_v31 = vpop.f32.mrb[5].mxu1 }
  0xff   :  { %v455_v32 = vpop.f32.mrb[6].mxu0  ;;  %v463_v33 = vpop.f32.mrb[6].mxu1 }
 0x100   :  { %v387_v34 = vpack.c.bf16 %v455_v32, %v454_v28  ;;  %v407_v35 = vpack.c.bf16 %v463_v33, %v462_v29  ;;  %v193_v36 = vpop.f32.mrb[7].mxu0  ;;  %v225_v37 = vpop.f32.mrb[7].mxu1 }
 0x101   :  { %v382_v38 = vpack.c.bf16 %v193_v36, %v190_v30  ;;  %v402_v39 = vpack.c.bf16 %v225_v37, %v222_v31 }
 0x102   :  { %411 = vst [vmem:[%s585_s2 + $0x18] sm:$0xff] %v387_v34   ;;  %415 = vst [vmem:[%s585_s2 + $0x38] sm:$0xff] %v407_v35  }
 0x103   :  { %410 = vst [vmem:[%s585_s2 + $0x10] sm:$0xff] %v382_v38   ;;  %414 = vst [vmem:[%s585_s2 + $0x30] sm:$0xff] %v402_v39  }

// kernel: gcn_forward.4
= control target key start
LH: loop header
LB: loop body
LE: loop exit
PB: predicated region body
PF: predicated region fallthrough
CT: control target
= control target key end

     0   :  { %s970_s1 = inlined_call_operand.vmem [shape: bf16[128,128], index: 1, kind: input, shape index: {}]   ;;  %s971_s0 = inlined_call_operand.vmem [shape: bf16[128,128], index: 0, kind: input, shape index: {}]   ;;  %s972_s3 = inlined_call_operand.vmem [shape: bf16[128,128], index: 3, kind: input, shape index: {}]   ;;  %s973_s2 = inlined_call_operand.vmem [shape: f32[1,128], index: 2, kind: input, shape index: {}]   ;;  %s974_s4 = inlined_call_operand.vmem [shape: bf16[128,128], index: 4, kind: output, shape index: {}]  }
   0x1   :  { %v822_v0 = vld [vmem:[%s970_s1] sm:$0xff]   ;;  %v823_v1 = vld [vmem:[%s970_s1 + $0x8] sm:$0xff]   ;;  %v824_v2 = vld [vmem:[%s970_s1 + $0x10] sm:$0xff]  }
   0x2   :  { %758 = vmatprep.subr.bf16.mxu0 %v822_v0  ;;  %v825_v3 = vld [vmem:[%s970_s1 + $0x18] sm:$0xff]   ;;  %v830_v4 = vld [vmem:[%s971_s0] sm:$0xff]   ;;  %v827_v6 = vld [vmem:[%s970_s1 + $0x28] sm:$0xff]  }
   0x3   :  { %759 = vmatpush3.bf16.msra.mxu0 %v822_v0  ;;  %774 = vmatprep.mubr.bf16.mxu0 %v830_v4  ;;  %v826_v5 = vld [vmem:[%s970_s1 + $0x20] sm:$0xff]   ;;  %v839_v8 = vld [vmem:[%s972_s3 + $0x8] sm:$0xff]   ;;  %v828_v9 = vld [vmem:[%s970_s1 + $0x30] sm:$0xff]  }
   0x4   :  { %760 = vmatprep.subr.bf16.mxu0 %v823_v1  ;;  %v838_v7 = vld [vmem:[%s972_s3] sm:$0xff]   ;;  %v840_v10 = vld [vmem:[%s972_s3 + $0x10] sm:$0xff]   ;;  %v829_v11 = vld [vmem:[%s970_s1 + $0x38] sm:$0xff]  }
   0x5   :  { %790 = vmatprep.subr.bf16.mxu1 %v838_v7  ;;  %v841_v12 = vld [vmem:[%s972_s3 + $0x18] sm:$0xff]   ;;  %v842_v13 = vld [vmem:[%s972_s3 + $0x20] sm:$0xff]   ;;  %v831_v14 = vld [vmem:[%s971_s0 + $0x8] sm:$0xff]  }
   0x6   :  { %791 = vmatpush3.bf16.msra.mxu1 %v838_v7  ;;  %v832_v15 = vld [vmem:[%s971_s0 + $0x10] sm:$0xff]   ;;  %v843_v16 = vld [vmem:[%s972_s3 + $0x28] sm:$0xff]   ;;  %v833_v17 = vld [vmem:[%s971_s0 + $0x18] sm:$0xff]  }
   0x7   :  { %761 = vmatpush3.bf16.msra.mxu0 %v823_v1  ;;  %792 = vmatprep.subr.bf16.mxu1 %v839_v8  ;;  %v834_v18 = vld [vmem:[%s971_s0 + $0x20] sm:$0xff]   ;;  %v835_v19 = vld [vmem:[%s971_s0 + $0x28] sm:$0xff]   ;;  %v836_v20 = vld [vmem:[%s971_s0 + $0x30] sm:$0xff]  }
   0x8   :  { %762 = vmatprep.subr.bf16.mxu0 %v824_v2  ;;  %v837_v21 = vld [vmem:[%s971_s0 + $0x38] sm:$0xff]   ;;  %v844_v22 = vld [vmem:[%s972_s3 + $0x30] sm:$0xff]   ;;  %v638_v24 = vld [vmem:[%s973_s2] ss:$0 sm:$0xff] }
   0x9   :  { %v845_v23 = vld [vmem:[%s972_s3 + $0x38] sm:$0xff]  }
   0xa   :  { %793 = vmatpush3.bf16.msra.mxu1 %v839_v8 }
   0xb   :  { %763 = vmatpush3.bf16.msra.mxu0 %v824_v2  ;;  %794 = vmatprep.subr.bf16.mxu1 %v840_v10 }
   0xc   :  { %764 = vmatprep.subr.bf16.mxu0 %v825_v3 }
   0xe   :  { %795 = vmatpush3.bf16.msra.mxu1 %v840_v10 }
   0xf   :  { %765 = vmatpush3.bf16.msra.mxu0 %v825_v3  ;;  %796 = vmatprep.subr.bf16.mxu1 %v841_v12 }
  0x10   :  { %766 = vmatprep.subr.bf16.mxu0 %v826_v5 }
  0x12   :  { %797 = vmatpush3.bf16.msra.mxu1 %v841_v12 }
  0x13   :  { %767 = vmatpush3.bf16.msra.mxu0 %v826_v5  ;;  %798 = vmatprep.subr.bf16.mxu1 %v842_v13 }
  0x14   :  { %768 = vmatprep.subr.bf16.mxu0 %v827_v6 }
  0x16   :  { %799 = vmatpush3.bf16.msra.mxu1 %v842_v13 }
  0x17   :  { %769 = vmatpush3.bf16.msra.mxu0 %v827_v6  ;;  %800 = vmatprep.subr.bf16.mxu1 %v843_v16 }
  0x18   :  { %770 = vmatprep.subr.bf16.mxu0 %v828_v9 }
  0x1a   :  { %801 = vmatpush3.bf16.msra.mxu1 %v843_v16 }
  0x1b   :  { %771 = vmatpush3.bf16.msra.mxu0 %v828_v9  ;;  %802 = vmatprep.subr.bf16.mxu1 %v844_v22 }
  0x1c   :  { %772 = vmatprep.subr.bf16.mxu0 %v829_v11 }
  0x1e   :  { %803 = vmatpush3.bf16.msra.mxu1 %v844_v22 }
  0x1f   :  { %773 = vmatpush3.bf16.msra.mxu0 %v829_v11  ;;  %804 = vmatprep.subr.bf16.mxu1 %v845_v23 }
  0x22   :  { %775 = vmatmul.mubr.bf16.vlgmr.msra.gmra.mrb[0].mxu0 %v831_v14  ;;  %805 = vmatpush3.bf16.msra.mxu1 %v845_v23 }
  0x23   :  { %778 = vmatprep.mubr.bf16.mxu0 %v832_v15 }
  0x2a   :  { %779 = vmatmul.mubr.bf16.gmra.mrb[4].mxu0 %v833_v17 }
  0x2b   :  { %782 = vmatprep.mubr.bf16.mxu0 %v834_v18 }
  0x32   :  { %783 = vmatmul.mubr.bf16.gmra.mrb[8].mxu0 %v835_v19 }
  0x33   :  { %786 = vmatprep.mubr.bf16.mxu0 %v836_v20 }
  0x3a   :  { %787 = vmatmul.mubr.bf16.gmra.mrb[12].mxu0 %v837_v21 }
  0xf5   :  { %v776_v25 = vpop.f32.mrb[0].mxu0 }
  0xf6   :  { %v339_v26 = vadd.f32 %v776_v25, %v638_v24  ;;  %v216_v27 = vpop.f32.mrb[1].mxu0 }
  0xf7   :  { %v337_v28 = vadd.f32 %v638_v24, %v216_v27  ;;  %v777_v29 = vpop.f32.mrb[2].mxu0 }
  0xf8   :  { %v340_v30 = vadd.f32 %v777_v29, %v638_v24  ;;  %v219_v31 = vpop.f32.mrb[3].mxu0  ;;  %v355_v33 = vmax.f32 %v339_v26, 0.0 }
  0xf9   :  { %v338_v32 = vadd.f32 %v638_v24, %v219_v31  ;;  %v353_v35 = vmax.f32 %v337_v28, 0.0 }
  0xfa   :  { %v356_v34 = vmax.f32 %v340_v30, 0.0 }
  0xfb   :  { %v354_v36 = vmax.f32 %v338_v32, 0.0 }
  0xfc   :  { %v370_v37 = vpack.c.bf16 %v356_v34, %v355_v33 }
  0xfd   :  { %v780_v38 = vpop.f32.mrb[4].mxu0  ;;  %v369_v39 = vpack.c.bf16 %v354_v36, %v353_v35 }
  0xfe   :  { %v343_v40 = vadd.f32 %v780_v38, %v638_v24  ;;  %v232_v41 = vpop.f32.mrb[5].mxu0 }
  0xff   :  { %v341_v42 = vadd.f32 %v638_v24, %v232_v41  ;;  %v781_v43 = vpop.f32.mrb[6].mxu0  ;;  %806 = vmatprep.mubr.bf16.mxu1 %v369_v39 }
 0x100   :  { %v344_v44 = vadd.f32 %v781_v43, %v638_v24  ;;  %v235_v45 = vpop.f32.mrb[7].mxu0  ;;  %807 = vmatmul.mubr.bf16.vlgmr.msra.gmra.mrb[0].mxu1 %v370_v37  ;;  %v359_v47 = vmax.f32 %v343_v40, 0.0 }
 0x101   :  { %v342_v46 = vadd.f32 %v638_v24, %v235_v45  ;;  %v357_v49 = vmax.f32 %v341_v42, 0.0 }
 0x102   :  { %v360_v48 = vmax.f32 %v344_v44, 0.0 }
 0x103   :  { %v358_v50 = vmax.f32 %v342_v46, 0.0 }
 0x104   :  { %v372_v51 = vpack.c.bf16 %v360_v48, %v359_v47 }
 0x105   :  { %v371_v52 = vpack.c.bf16 %v358_v50, %v357_v49  ;;  %v784_v53 = vpop.f32.mrb[8].mxu0 }
 0x106   :  { %v347_v54 = vadd.f32 %v784_v53, %v638_v24  ;;  %v248_v55 = vpop.f32.mrb[9].mxu0 }
 0x107   :  { %v345_v56 = vadd.f32 %v638_v24, %v248_v55  ;;  %v785_v57 = vpop.f32.mrb[10].mxu0  ;;  %810 = vmatprep.mubr.bf16.mxu1 %v371_v52 }
 0x108   :  { %v348_v58 = vadd.f32 %v785_v57, %v638_v24  ;;  %v251_v59 = vpop.f32.mrb[11].mxu0  ;;  %811 = vmatmul.mubr.bf16.gmra.mrb[4].mxu1 %v372_v51  ;;  %v363_v61 = vmax.f32 %v347_v54, 0.0 }
 0x109   :  { %v346_v60 = vadd.f32 %v638_v24, %v251_v59  ;;  %v361_v63 = vmax.f32 %v345_v56, 0.0 }
 0x10a   :  { %v364_v62 = vmax.f32 %v348_v58, 0.0 }
 0x10b   :  { %v362_v0 = vmax.f32 %v346_v60, 0.0 }
 0x10c   :  { %v374_v1 = vpack.c.bf16 %v364_v62, %v363_v61 }
 0x10d   :  { %v373_v2 = vpack.c.bf16 %v362_v0, %v361_v63  ;;  %v788_v3 = vpop.f32.mrb[12].mxu0 }
 0x10e   :  { %v351_v4 = vadd.f32 %v788_v3, %v638_v24  ;;  %v264_v5 = vpop.f32.mrb[13].mxu0 }
 0x10f   :  { %v349_v6 = vadd.f32 %v638_v24, %v264_v5  ;;  %v789_v7 = vpop.f32.mrb[14].mxu0  ;;  %814 = vmatprep.mubr.bf16.mxu1 %v373_v2 }
 0x110   :  { %v352_v8 = vadd.f32 %v789_v7, %v638_v24  ;;  %v267_v9 = vpop.f32.mrb[15].mxu0  ;;  %815 = vmatmul.mubr.bf16.gmra.mrb[8].mxu1 %v374_v1  ;;  %v367_v11 = vmax.f32 %v351_v4, 0.0 }
 0x111   :  { %v350_v10 = vadd.f32 %v638_v24, %v267_v9  ;;  %v365_v13 = vmax.f32 %v349_v6, 0.0 }
 0x112   :  { %v368_v12 = vmax.f32 %v352_v8, 0.0 }
 0x113   :  { %v366_v14 = vmax.f32 %v350_v10, 0.0 }
 0x114   :  { %v376_v15 = vpack.c.bf16 %v368_v12, %v367_v11 }
 0x115   :  { %v375_v16 = vpack.c.bf16 %v366_v14, %v365_v13 }
 0x117   :  { %818 = vmatprep.mubr.bf16.mxu1 %v375_v16 }
 0x118   :  { %819 = vmatmul.mubr.bf16.gmra.mrb[12].mxu1 %v376_v15 }
 0x1d3   :  { %v808_v17 = vpop.f32.mrb[0].mxu1 }
 0x1d4   :  { %v475_v18 = vpop.f32.mrb[1].mxu1 }
 0x1d5   :  { %v809_v19 = vpop.f32.mrb[2].mxu1 }
 0x1d6   :  { %v687_v20 = vpack.c.bf16 %v809_v19, %v808_v17  ;;  %v478_v21 = vpop.f32.mrb[3].mxu1 }
 0x1d7   :  { %v682_v22 = vpack.c.bf16 %v478_v21, %v475_v18 }
 0x1d8   :  { %719 = vst [vmem:[%s974_s4 + $0x8] sm:$0xff] %v687_v20  }
 0x1d9   :  { %683 = vst [vmem:[%s974_s4] sm:$0xff] %v682_v22  }
 0x1db   :  { %v812_v23 = vpop.f32.mrb[4].mxu1 }
 0x1dc   :  { %v491_v24 = vpop.f32.mrb[5].mxu1 }
 0x1dd   :  { %v813_v25 = vpop.f32.mrb[6].mxu1 }
 0x1de   :  { %v697_v26 = vpack.c.bf16 %v813_v25, %v812_v23  ;;  %v494_v27 = vpop.f32.mrb[7].mxu1 }
 0x1df   :  { %v692_v28 = vpack.c.bf16 %v494_v27, %v491_v24 }
 0x1e0   :  { %721 = vst [vmem:[%s974_s4 + $0x18] sm:$0xff] %v697_v26  }
 0x1e1   :  { %720 = vst [vmem:[%s974_s4 + $0x10] sm:$0xff] %v692_v28  }
 0x1e3   :  { %v816_v29 = vpop.f32.mrb[8].mxu1 }
 0x1e4   :  { %v507_v30 = vpop.f32.mrb[9].mxu1 }
 0x1e5   :  { %v817_v31 = vpop.f32.mrb[10].mxu1 }
 0x1e6   :  { %v707_v32 = vpack.c.bf16 %v817_v31, %v816_v29  ;;  %v510_v33 = vpop.f32.mrb[11].mxu1 }
 0x1e7   :  { %v702_v34 = vpack.c.bf16 %v510_v33, %v507_v30 }
 0x1e8   :  { %723 = vst [vmem:[%s974_s4 + $0x28] sm:$0xff] %v707_v32  }
 0x1e9   :  { %722 = vst [vmem:[%s974_s4 + $0x20] sm:$0xff] %v702_v34  }
 0x1eb   :  { %v820_v35 = vpop.f32.mrb[12].mxu1 }
 0x1ec   :  { %v523_v36 = vpop.f32.mrb[13].mxu1 }
 0x1ed   :  { %v821_v37 = vpop.f32.mrb[14].mxu1 }
 0x1ee   :  { %v717_v38 = vpack.c.bf16 %v821_v37, %v820_v35  ;;  %v526_v39 = vpop.f32.mrb[15].mxu1 }
 0x1ef   :  { %v712_v40 = vpack.c.bf16 %v526_v39, %v523_v36 }
 0x1f0   :  { %725 = vst [vmem:[%s974_s4 + $0x38] sm:$0xff] %v717_v38  }
 0x1f1   :  { %724 = vst [vmem:[%s974_s4 + $0x30] sm:$0xff] %v712_v40  }

// kernel: gcn_forward.5
= control target key start
LH: loop header
LB: loop body
LE: loop exit
PB: predicated region body
PF: predicated region fallthrough
CT: control target
= control target key end

     0   :  { %s891_s1 = inlined_call_operand.vmem [shape: bf16[128,128], index: 1, kind: input, shape index: {}]   ;;  %s892_s0 = inlined_call_operand.vmem [shape: bf16[128,128], index: 0, kind: input, shape index: {}]   ;;  %s893_s2 = inlined_call_operand.vmem [shape: f32[1,128], index: 2, kind: input, shape index: {}]   ;;  %s894_s3 = inlined_call_operand.vmem [shape: f32[128,128], index: 3, kind: output, shape index: {}]  }
   0x1   :  { %v612_v0 = vld [vmem:[%s891_s1] sm:$0xff]   ;;  %v613_v1 = vld [vmem:[%s891_s1 + $0x8] sm:$0xff]   ;;  %v614_v2 = vld [vmem:[%s891_s1 + $0x10] sm:$0xff]  }
   0x2   :  { %563 = vmatprep.subr.bf16.mxu0 %v612_v0  ;;  %595 = vmatprep.subr.bf16.mxu1 %v612_v0  ;;  %v615_v3 = vld [vmem:[%s891_s1 + $0x18] sm:$0xff]   ;;  %v620_v4 = vld [vmem:[%s892_s0] sm:$0xff]   ;;  %v617_v7 = vld [vmem:[%s891_s1 + $0x28] sm:$0xff]  }
   0x3   :  { %564 = vmatpush3.bf16.msra.mxu0 %v612_v0  ;;  %603 = vmatpush3.bf16.msra.mxu1 %v612_v0  ;;  %v621_v5 = vld [vmem:[%s892_s0 + $0x20] sm:$0xff]   ;;  %v618_v8 = vld [vmem:[%s891_s1 + $0x30] sm:$0xff]   ;;  %v619_v9 = vld [vmem:[%s891_s1 + $0x38] sm:$0xff]  }
   0x4   :  { %565 = vmatprep.subr.bf16.mxu0 %v613_v1  ;;  %596 = vmatprep.subr.bf16.mxu1 %v613_v1  ;;  %v616_v6 = vld [vmem:[%s891_s1 + $0x20] sm:$0xff]   ;;  %v622_v10 = vld [vmem:[%s892_s0 + $0x8] sm:$0xff]   ;;  %v624_v12 = vld [vmem:[%s892_s0 + $0x10] sm:$0xff]  }
   0x5   :  { %579 = vmatprep.mubr.bf16.mxu0 %v620_v4  ;;  %587 = vmatprep.mubr.bf16.mxu1 %v621_v5  ;;  %v623_v11 = vld [vmem:[%s892_s0 + $0x28] sm:$0xff]   ;;  %v626_v13 = vld [vmem:[%s892_s0 + $0x30] sm:$0xff]   ;;  %v625_v14 = vld [vmem:[%s892_s0 + $0x18] sm:$0xff]  }
   0x6   :  { %v627_v15 = vld [vmem:[%s892_s0 + $0x38] sm:$0xff]   ;;  %v546_v18 = vld [vmem:[%s893_s2] ss:$0 sm:$0xff] }
   0x7   :  { %566 = vmatpush3.bf16.msra.mxu0 %v613_v1  ;;  %604 = vmatpush3.bf16.msra.mxu1 %v613_v1 }
   0x8   :  { %567 = vmatprep.subr.bf16.mxu0 %v614_v2  ;;  %597 = vmatprep.subr.bf16.mxu1 %v614_v2 }
   0xb   :  { %568 = vmatpush3.bf16.msra.mxu0 %v614_v2  ;;  %605 = vmatpush3.bf16.msra.mxu1 %v614_v2 }
   0xc   :  { %569 = vmatprep.subr.bf16.mxu0 %v615_v3  ;;  %598 = vmatprep.subr.bf16.mxu1 %v615_v3 }
   0xf   :  { %570 = vmatpush3.bf16.msra.mxu0 %v615_v3  ;;  %606 = vmatpush3.bf16.msra.mxu1 %v615_v3 }
  0x10   :  { %571 = vmatprep.subr.bf16.mxu0 %v616_v6  ;;  %599 = vmatprep.subr.bf16.mxu1 %v616_v6 }
  0x13   :  { %572 = vmatpush3.bf16.msra.mxu0 %v616_v6  ;;  %607 = vmatpush3.bf16.msra.mxu1 %v616_v6 }
  0x14   :  { %573 = vmatprep.subr.bf16.mxu0 %v617_v7  ;;  %600 = vmatprep.subr.bf16.mxu1 %v617_v7 }
  0x17   :  { %574 = vmatpush3.bf16.msra.mxu0 %v617_v7  ;;  %608 = vmatpush3.bf16.msra.mxu1 %v617_v7 }
  0x18   :  { %575 = vmatprep.subr.bf16.mxu0 %v618_v8  ;;  %601 = vmatprep.subr.bf16.mxu1 %v618_v8 }
  0x1b   :  { %576 = vmatpush3.bf16.msra.mxu0 %v618_v8  ;;  %609 = vmatpush3.bf16.msra.mxu1 %v618_v8 }
  0x1c   :  { %577 = vmatprep.subr.bf16.mxu0 %v619_v9  ;;  %602 = vmatprep.subr.bf16.mxu1 %v619_v9 }
  0x1f   :  { %578 = vmatpush3.bf16.msra.mxu0 %v619_v9  ;;  %610 = vmatpush3.bf16.msra.mxu1 %v619_v9 }
  0x22   :  { %580 = vmatmul.mubr.bf16.vlgmr.msra.gmra.mrb[0].mxu0 %v622_v10  ;;  %588 = vmatmul.mubr.bf16.vlgmr.msra.gmra.mrb[0].mxu1 %v623_v11 }
  0x23   :  { %583 = vmatprep.mubr.bf16.mxu0 %v624_v12  ;;  %591 = vmatprep.mubr.bf16.mxu1 %v626_v13 }
  0x2a   :  { %584 = vmatmul.mubr.bf16.gmra.mrb[4].mxu0 %v625_v14  ;;  %592 = vmatmul.mubr.bf16.gmra.mrb[4].mxu1 %v627_v15 }
  0xf5   :  { %v581_v16 = vpop.f32.mrb[0].mxu0  ;;  %v589_v17 = vpop.f32.mrb[0].mxu1 }
  0xf6   :  { %v213_v19 = vpop.f32.mrb[1].mxu0  ;;  %v245_v20 = vpop.f32.mrb[1].mxu1  ;;  %v344_v25 = vadd.f32 %v589_v17, %v546_v18  ;;  %v336_v26 = vadd.f32 %v581_v16, %v546_v18 }
  0xf7   :  { %v582_v21 = vpop.f32.mrb[2].mxu0  ;;  %v590_v22 = vpop.f32.mrb[2].mxu1  ;;  %v334_v27 = vadd.f32 %v546_v18, %v213_v19  ;;  %v342_v36 = vadd.f32 %v546_v18, %v245_v20 }
  0xf8   :  { %v216_v23 = vpop.f32.mrb[3].mxu0  ;;  %v248_v24 = vpop.f32.mrb[3].mxu1  ;;  %370 = vmax.xlane.f32.xlu0 %v344_v25  ;;  %354 = vmax.xlane.f32.xlu1 %v336_v26  ;;  %v337_v28 = vadd.f32 %v582_v21, %v546_v18  ;;  %v345_v37 = vadd.f32 %v590_v22, %v546_v18 }
  0xf9   :  { %v343_v39 = vadd.f32 %v546_v18, %v248_v24  ;;  %v335_v40 = vadd.f32 %v546_v18, %v216_v23 }
  0xfc   :  { %350 = vmax.xlane.f32.xlu0 %v334_v27  ;;  %356 = vmax.xlane.f32.xlu1 %v337_v28 }
  0xfd   :  { %v585_v29 = vpop.f32.mrb[4].mxu0  ;;  %v593_v30 = vpop.f32.mrb[4].mxu1 }
  0xfe   :  { %v229_v31 = vpop.f32.mrb[5].mxu0  ;;  %v261_v32 = vpop.f32.mrb[5].mxu1  ;;  %v340_v41 = vadd.f32 %v585_v29, %v546_v18  ;;  %v769_v47 = vadd.f32 %v593_v30, %v546_v18 }
  0xff   :  { %v586_v33 = vpop.f32.mrb[6].mxu0  ;;  %v594_v34 = vpop.f32.mrb[6].mxu1  ;;  %v338_v43 = vadd.f32 %v546_v18, %v229_v31  ;;  %v763_v45 = vadd.f32 %v546_v18, %v261_v32 }
 0x100   :  { %v232_v35 = vpop.f32.mrb[7].mxu0  ;;  %v264_v38 = vpop.f32.mrb[7].mxu1  ;;  %366 = vmax.xlane.f32.xlu0 %v342_v36  ;;  %372 = vmax.xlane.f32.xlu1 %v345_v37  ;;  %v341_v42 = vadd.f32 %v586_v33, %v546_v18  ;;  %v771_v48 = vadd.f32 %v594_v34, %v546_v18 }
 0x101   :  { %v339_v44 = vadd.f32 %v546_v18, %v232_v35  ;;  %v765_v46 = vadd.f32 %v546_v18, %v264_v38 }
 0x104   :  { %368 = vmax.xlane.f32.xlu1 %v343_v39  ;;  %352 = vmax.xlane.f32.xlu0 %v335_v40 }
 0x108   :  { %362 = vmax.xlane.f32.xlu0 %v340_v41  ;;  %364 = vmax.xlane.f32.xlu1 %v341_v42 }
 0x10c   :  { %358 = vmax.xlane.f32.xlu0 %v338_v43  ;;  %360 = vmax.xlane.f32.xlu1 %v339_v44 }
 0x110   :  { %374 = vmax.xlane.f32.xlu0 %v763_v45  ;;  %376 = vmax.xlane.f32.xlu1 %v765_v46 }
 0x114   :  { %378 = vmax.xlane.f32.xlu0 %v769_v47  ;;  %380 = vmax.xlane.f32.xlu1 %v771_v48 }
 0x185   :  { %v371_v49 = vpop.xlane.xlu0 %370  ;;  %v355_v50 = vpop.xlane.xlu1 %354 }
 0x186   :  { %v775_v51 = vsub.f32 %v344_v25, %v371_v49  ;;  %v777_v52 = vsub.f32 %v336_v26, %v355_v50 }
 0x188   :  { %v402_v53 = vmul.f32 1.442695, %v777_v52  ;;  %v418_v56 = vmul.f32 1.442695, %v775_v51 }
 0x189   :  { %v351_v54 = vpop.xlane.xlu0 %350  ;;  %v357_v55 = vpop.xlane.xlu1 %356 }
 0x18a   :  { %v781_v57 = vsub.f32 %v334_v27, %v351_v54  ;;  %v783_v58 = vsub.f32 %v337_v28, %v357_v55  ;;  %628 = vpow2.f32 %v402_v53 }
 0x18b   :  { %630 = vpow2.f32 %v418_v56 }
 0x18c   :  { %v404_v59 = vmul.f32 1.442695, %v783_v58  ;;  %v398_v62 = vmul.f32 1.442695, %v781_v57 }
 0x18d   :  { %v367_v60 = vpop.xlane.xlu0 %366  ;;  %v373_v61 = vpop.xlane.xlu1 %372 }
 0x18e   :  { %v787_v63 = vsub.f32 %v342_v36, %v367_v60  ;;  %v789_v0 = vsub.f32 %v345_v37, %v373_v61  ;;  %632 = vpow2.f32 %v404_v59 }
 0x18f   :  { %634 = vpow2.f32 %v398_v62 }
 0x190   :  { %v420_v1 = vmul.f32 1.442695, %v789_v0  ;;  %v414_v4 = vmul.f32 1.442695, %v787_v63 }
 0x191   :  { %v369_v2 = vpop.xlane.xlu1 %368  ;;  %v353_v3 = vpop.xlane.xlu0 %352 }
 0x192   :  { %v793_v5 = vsub.f32 %v335_v40, %v353_v3  ;;  %636 = vpow2.f32 %v420_v1  ;;  %v795_v6 = vsub.f32 %v343_v39, %v369_v2 }
 0x193   :  { %638 = vpow2.f32 %v414_v4 }
 0x194   :  { %v400_v7 = vmul.f32 1.442695, %v793_v5  ;;  %v629_v8 = vpop.eup %628  ;;  %v416_v12 = vmul.f32 1.442695, %v795_v6 }
 0x195   :  { %v363_v9 = vpop.xlane.xlu0 %362  ;;  %v365_v10 = vpop.xlane.xlu1 %364  ;;  %434 = vadd.xlane.f32.xlu0 %v629_v8 }
 0x196   :  { %v798_v11 = vsub.f32 %v340_v41, %v363_v9  ;;  %640 = vpow2.f32 %v400_v7  ;;  %v801_v13 = vsub.f32 %v341_v42, %v365_v10  ;;  %v631_v14 = vpop.eup %630 }
 0x198   :  { %v410_v15 = vmul.f32 1.442695, %v798_v11  ;;  %v633_v16 = vpop.eup %632  ;;  %v412_v20 = vmul.f32 1.442695, %v801_v13 }
 0x199   :  { %v359_v17 = vpop.xlane.xlu0 %358  ;;  %v361_v18 = vpop.xlane.xlu1 %360  ;;  %450 = vadd.xlane.f32.xlu0 %v631_v14  ;;  %436 = vadd.xlane.f32.xlu1 %v633_v16 }
 0x19a   :  { %642 = vpow2.f32 %v410_v15  ;;  %v804_v19 = vsub.f32 %v338_v43, %v359_v17  ;;  %v807_v21 = vsub.f32 %v339_v44, %v361_v18  ;;  %v635_v22 = vpop.eup %634 }
 0x19b   :  { %644 = vpow2.f32 %v416_v12 }
 0x19c   :  { %v406_v23 = vmul.f32 1.442695, %v804_v19  ;;  %v637_v24 = vpop.eup %636  ;;  %v408_v28 = vmul.f32 1.442695, %v807_v21 }
 0x19d   :  { %v375_v25 = vpop.xlane.xlu0 %374  ;;  %v377_v26 = vpop.xlane.xlu1 %376  ;;  %430 = vadd.xlane.f32.xlu0 %v635_v22  ;;  %452 = vadd.xlane.f32.xlu1 %v637_v24 }
 0x19e   :  { %646 = vpow2.f32 %v406_v23  ;;  %v811_v27 = vsub.f32 %v763_v45, %v375_v25  ;;  %v815_v29 = vsub.f32 %v765_v46, %v377_v26  ;;  %v639_v30 = vpop.eup %638 }
 0x19f   :  { %648 = vpow2.f32 %v412_v20 }
 0x1a0   :  { %v422_v31 = vmul.f32 1.442695, %v811_v27  ;;  %v641_v32 = vpop.eup %640  ;;  %v424_v36 = vmul.f32 1.442695, %v815_v29 }
 0x1a1   :  { %v379_v33 = vpop.xlane.xlu0 %378  ;;  %v381_v34 = vpop.xlane.xlu1 %380  ;;  %446 = vadd.xlane.f32.xlu0 %v639_v30  ;;  %432 = vadd.xlane.f32.xlu1 %v641_v32 }
 0x1a2   :  { %650 = vpow2.f32 %v422_v31  ;;  %v819_v35 = vsub.f32 %v769_v47, %v379_v33  ;;  %v823_v37 = vsub.f32 %v771_v48, %v381_v34 }
 0x1a3   :  { %652 = vpow2.f32 %v408_v28 }
 0x1a4   :  { %v643_v38 = vpop.eup %642  ;;  %v426_v39 = vmul.f32 1.442695, %v819_v35  ;;  %v428_v41 = vmul.f32 1.442695, %v823_v37 }
 0x1a5   :  { %v645_v40 = vpop.eup %644  ;;  %442 = vadd.xlane.f32.xlu0 %v643_v38 }
 0x1a6   :  { %654 = vpow2.f32 %v426_v39  ;;  %448 = vadd.xlane.f32.xlu1 %v645_v40 }
 0x1a7   :  { %656 = vpow2.f32 %v424_v36 }
 0x1a8   :  { %v647_v42 = vpop.eup %646  ;;  %658 = vpow2.f32 %v428_v41 }
 0x1a9   :  { %v649_v43 = vpop.eup %648  ;;  %438 = vadd.xlane.f32.xlu0 %v647_v42 }
 0x1aa   :  { %444 = vadd.xlane.f32.xlu1 %v649_v43 }
 0x1ac   :  { %v651_v44 = vpop.eup %650 }
 0x1ad   :  { %v653_v45 = vpop.eup %652  ;;  %454 = vadd.xlane.f32.xlu0 %v651_v44 }
 0x1ae   :  { %440 = vadd.xlane.f32.xlu1 %v653_v45 }
 0x1b0   :  { %v655_v46 = vpop.eup %654 }
 0x1b1   :  { %v657_v47 = vpop.eup %656  ;;  %458 = vadd.xlane.f32.xlu0 %v655_v46 }
 0x1b2   :  { %456 = vadd.xlane.f32.xlu1 %v657_v47  ;;  %v659_v48 = vpop.eup %658 }
 0x1b6   :  { %460 = vadd.xlane.f32.xlu1 %v659_v48 }
 0x222   :  { %v435_v49 = vpop.xlane.xlu0 %434 }
 0x223   :  { %660 = vlog2.f32 %v435_v49 }
 0x226   :  { %v451_v50 = vpop.xlane.xlu0 %450  ;;  %v437_v53 = vpop.xlane.xlu1 %436 }
 0x227   :  { %662 = vlog2.f32 %v451_v50 }
 0x228   :  { %664 = vlog2.f32 %v437_v53 }
 0x22a   :  { %v431_v54 = vpop.xlane.xlu0 %430  ;;  %v453_v55 = vpop.xlane.xlu1 %452 }
 0x22b   :  { %666 = vlog2.f32 %v431_v54 }
 0x22c   :  { %668 = vlog2.f32 %v453_v55 }
 0x22d   :  { %v661_v56 = vpop.eup %660 }
 0x22e   :  { %v467_v59 = vmul.f32 0.6931472, %v661_v56  ;;  %v447_v60 = vpop.xlane.xlu0 %446  ;;  %v433_v61 = vpop.xlane.xlu1 %432 }
 0x22f   :  { %670 = vlog2.f32 %v447_v60 }
 0x230   :  { %v496_v62 = vsub.f32 %v777_v52, %v467_v59  ;;  %672 = vlog2.f32 %v433_v61 }
 0x231   :  { %v663_v1 = vpop.eup %662 }
 0x232   :  { %v665_v2 = vpop.eup %664  ;;  %512 = vst [vmem:[%s894_s3 + $0x10] sm:$0xff] %v496_v62  ;;  %v483_v3 = vmul.f32 0.6931472, %v663_v1  ;;  %v443_v4 = vpop.xlane.xlu0 %442 }
 0x233   :  { %v449_v7 = vpop.xlane.xlu1 %448  ;;  %v469_v8 = vmul.f32 0.6931472, %v665_v2  ;;  %674 = vlog2.f32 %v443_v4 }
 0x234   :  { %v504_v9 = vsub.f32 %v775_v51, %v483_v3  ;;  %676 = vlog2.f32 %v449_v7 }
 0x235   :  { %v667_v10 = vpop.eup %666  ;;  %v497_v12 = vsub.f32 %v783_v58, %v469_v8 }
 0x236   :  { %v669_v14 = vpop.eup %668  ;;  %520 = vst [vmem:[%s894_s3 + $0x50] sm:$0xff] %v504_v9  ;;  %v463_v52 = vmul.f32 0.6931472, %v667_v10  ;;  %v439_v15 = vpop.xlane.xlu0 %438 }
 0x237   :  { %v445_v16 = vpop.xlane.xlu1 %444  ;;  %513 = vst [vmem:[%s894_s3 + $0x18] sm:$0xff] %v497_v12  ;;  %v485_v17 = vmul.f32 0.6931472, %v669_v14  ;;  %678 = vlog2.f32 %v439_v15 }
 0x238   :  { %v494_v51 = vsub.f32 %v781_v57, %v463_v52  ;;  %680 = vlog2.f32 %v445_v16 }
 0x239   :  { %v671_v18 = vpop.eup %670  ;;  %v505_v58 = vsub.f32 %v789_v0, %v485_v17 }
 0x23a   :  { %v673_v20 = vpop.eup %672  ;;  %510 = vst [vmem:[%s894_s3] sm:$0xff] %v494_v51  ;;  %v479_v22 = vmul.f32 0.6931472, %v671_v18  ;;  %v455_v23 = vpop.xlane.xlu0 %454 }
 0x23b   :  { %v441_v24 = vpop.xlane.xlu1 %440  ;;  %521 = vst [vmem:[%s894_s3 + $0x58] sm:$0xff] %v505_v58  ;;  %v465_v25 = vmul.f32 0.6931472, %v673_v20  ;;  %682 = vlog2.f32 %v455_v23 }
 0x23c   :  { %v502_v57 = vsub.f32 %v787_v63, %v479_v22  ;;  %684 = vlog2.f32 %v441_v24 }
 0x23d   :  { %v675_v26 = vpop.eup %674  ;;  %v495_v0 = vsub.f32 %v793_v5, %v465_v25 }
 0x23e   :  { %v677_v28 = vpop.eup %676  ;;  %518 = vst [vmem:[%s894_s3 + $0x40] sm:$0xff] %v502_v57  ;;  %v475_v30 = vmul.f32 0.6931472, %v675_v26  ;;  %v459_v31 = vpop.xlane.xlu0 %458 }
 0x23f   :  { %v457_v32 = vpop.xlane.xlu1 %456  ;;  %511 = vst [vmem:[%s894_s3 + $0x8] sm:$0xff] %v495_v0  ;;  %v481_v33 = vmul.f32 0.6931472, %v677_v28  ;;  %686 = vlog2.f32 %v459_v31 }
 0x240   :  { %v500_v63 = vsub.f32 %v798_v11, %v475_v30  ;;  %688 = vlog2.f32 %v457_v32 }
 0x241   :  { %v679_v34 = vpop.eup %678  ;;  %v503_v5 = vsub.f32 %v795_v6, %v481_v33 }
 0x242   :  { %v681_v36 = vpop.eup %680  ;;  %516 = vst [vmem:[%s894_s3 + $0x30] sm:$0xff] %v500_v63  ;;  %v471_v38 = vmul.f32 0.6931472, %v679_v34 }
 0x243   :  { %v461_v39 = vpop.xlane.xlu1 %460  ;;  %519 = vst [vmem:[%s894_s3 + $0x48] sm:$0xff] %v503_v5  ;;  %v477_v40 = vmul.f32 0.6931472, %v681_v36 }
 0x244   :  { %690 = vlog2.f32 %v461_v39  ;;  %v498_v41 = vsub.f32 %v804_v19, %v471_v38 }
 0x245   :  { %v683_v11 = vpop.eup %682  ;;  %v501_v42 = vsub.f32 %v801_v13, %v477_v40 }
 0x246   :  { %v685_v43 = vpop.eup %684  ;;  %514 = vst [vmem:[%s894_s3 + $0x20] sm:$0xff] %v498_v41  ;;  %v487_v6 = vmul.f32 0.6931472, %v683_v11 }
 0x247   :  { %517 = vst [vmem:[%s894_s3 + $0x38] sm:$0xff] %v501_v42  ;;  %v473_v44 = vmul.f32 0.6931472, %v685_v43 }
 0x248   :  { %v506_v45 = vsub.f32 %v811_v27, %v487_v6 }
 0x249   :  { %v687_v46 = vpop.eup %686  ;;  %v499_v47 = vsub.f32 %v807_v21, %v473_v44 }
 0x24a   :  { %v689_v19 = vpop.eup %688  ;;  %522 = vst [vmem:[%s894_s3 + $0x60] sm:$0xff] %v506_v45  ;;  %v491_v13 = vmul.f32 0.6931472, %v687_v46 }
 0x24b   :  { %515 = vst [vmem:[%s894_s3 + $0x28] sm:$0xff] %v499_v47  ;;  %v489_v48 = vmul.f32 0.6931472, %v689_v19 }
 0x24c   :  { %v508_v49 = vsub.f32 %v819_v35, %v491_v13 }
 0x24d   :  { %v507_v53 = vsub.f32 %v815_v29, %v489_v48 }
 0x24e   :  { %v691_v50 = vpop.eup %690  ;;  %524 = vst [vmem:[%s894_s3 + $0x70] sm:$0xff] %v508_v49 }
 0x24f   :  { %v493_v21 = vmul.f32 0.6931472, %v691_v50  ;;  %523 = vst [vmem:[%s894_s3 + $0x68] sm:$0xff] %v507_v53 }
 0x251   :  { %v509_v27 = vsub.f32 %v823_v37, %v493_v21 }
 0x253   :  { %525 = vst [vmem:[%s894_s3 + $0x78] sm:$0xff] %v509_v27 }

</bundles_post_ra>
